<compile_context>
chip_gen: v7x
topology: tpu7x:2x2x1
jax: 0.10.0
libtpu: 0.0.40
codegen_flags: <defaults>
</compile_context>

<pallas_src>
import functools

import jax
import jax.numpy as jnp
from jax.experimental import pallas as pl
from jax.experimental.pallas import tpu as pltpu


def _round_up(n, m):
    return ((n + m - 1) // m) * m


def mlp_kernel(x_ref, w1_ref, b1_ref, w2_ref, b2_ref, w3_ref, b3_ref, o_ref):
    # Layer 1: x @ W1 + b1, ReLU. MXU operands in the weights' dtype (bf16),
    # f32 accumulation; bias/activation math stays f32 (v5e-safe).
    x = x_ref[...].astype(w1_ref.dtype)
    h1 = jnp.dot(x, w1_ref[...], preferred_element_type=jnp.float32)
    h1 = jnp.maximum(h1 + b1_ref[...], 0.0)

    # Dropout (dp1): eval-mode identity.
    # TODO(synk): training-mode dropout via pltpu.prng_seed + pltpu.stateful_bernoulli.

    # Layer 2: h1 @ W2 + b2, tanh (EUP, f32 input).
    h2 = jnp.dot(h1.astype(w2_ref.dtype), w2_ref[...],
                 preferred_element_type=jnp.float32)
    h2 = jnp.tanh(h2 + b2_ref[...])

    # Layer 3: h2 @ W3 + b3. D_out emitted directly (masked store; no lane padding).
    out = jnp.dot(h2.astype(w3_ref.dtype), w3_ref[...],
                  preferred_element_type=jnp.float32)
    o_ref[...] = (out + b3_ref[...]).astype(o_ref.dtype)


def prepare_params(params, compute_dtype=jnp.bfloat16):
    """One-time prep (call OUTSIDE the per-step forward): cast weights to the MXU
    dtype and reshape biases to [1, N] in f32. No feature-dim zero-padding — the MXU
    pads the contraction dim internally and sub-128 output lanes use masked stores,
    which is cheaper here than 4-8x HBM byte inflation plus wrapper pad/slice ops."""
    return {
        "w1": params["w1"].astype(compute_dtype),
        "b1": params["b1"].reshape(1, -1).astype(jnp.float32),
        "w2": params["w2"].astype(compute_dtype),
        "b2": params["b2"].reshape(1, -1).astype(jnp.float32),
        "w3": params["w3"].astype(compute_dtype),
        "b3": params["b3"].reshape(1, -1).astype(jnp.float32),
    }


def _choose_batch_tile(B, batch_tile, sublane=8):
    """Return (bt, B_pad). Prefer tiles that divide B exactly (no HBM batch padding)
    and keep >=2 grid steps when B allows so v7x can shard the 'parallel' axis over
    both TensorCores. A tile spanning the whole batch is exempt from the sublane rule."""
    if B <= batch_tile:
        half = B // 2
        if B % 2 == 0 and half >= sublane and half % sublane == 0:
            return half, B          # two parallel steps, no padding
        return B, B                 # single full-batch block (block == full array dim)
    bt = (batch_tile // sublane) * sublane
    while bt >= sublane:
        if B % bt == 0:
            return bt, B            # exact divisor: no padding, no ragged tile
        bt -= sublane
    return batch_tile, _round_up(B, batch_tile)   # fallback: minimal batch pad


@functools.partial(jax.jit, static_argnames=("batch_tile", "training"))
def net_forward(x, prepped, *, batch_tile=512, training=False):
    """x: [B, D_in] (f32). prepped: output of prepare_params (weights as [in, out],
    i.e. transpose of torch's [out, in]). Returns [B, D_out] in x.dtype."""
    if training:
        raise NotImplementedError("Only eval-mode (inference) dropout is implemented.")

    B, D_in = x.shape
    H = prepped["w1"].shape[1]
    H2 = prepped["w2"].shape[1]
    D_out = prepped["w3"].shape[1]

    bt, B_pad = _choose_batch_tile(B, batch_tile)
    x_in = x if B_pad == B else jnp.pad(x, ((0, B_pad - B), (0, 0)))
    grid = (B_pad // bt,)

    out = pl.pallas_call(
        mlp_kernel,
        out_shape=jax.ShapeDtypeStruct((B_pad, D_out), x.dtype),
        grid=grid,
        in_specs=[
            pl.BlockSpec((bt, D_in), lambda i: (i, 0)),    # x tile (streamed, no lane pad)
            pl.BlockSpec((D_in, H), lambda i: (0, 0)),     # W1 (resident)
            pl.BlockSpec((1, H), lambda i: (0, 0)),        # b1
            pl.BlockSpec((H, H2), lambda i: (0, 0)),       # W2 (resident)
            pl.BlockSpec((1, H2), lambda i: (0, 0)),       # b2
            pl.BlockSpec((H2, D_out), lambda i: (0, 0)),   # W3 (resident)
            pl.BlockSpec((1, D_out), lambda i: (0, 0)),    # b3
        ],
        out_specs=pl.BlockSpec((bt, D_out), lambda i: (i, 0)),
        compiler_params=pltpu.CompilerParams(
            dimension_semantics=("parallel",),
        ),
    )(x_in, prepped["w1"], prepped["b1"], prepped["w2"], prepped["b2"],
      prepped["w3"], prepped["b3"])

    return out if B_pad == B else out[:B]


def init_params(key, D_in, H, D_out):
    """nn.Linear-style U(-1/sqrt(fan_in), 1/sqrt(fan_in)) init. Weights stored as
    [in, out]. Second hidden width hardcoded to 64, as in the PyTorch module."""
    ks = jax.random.split(key, 6)

    def linear(kw, kb, fan_in, fan_out):
        bound = 1.0 / jnp.sqrt(fan_in)
        w = jax.random.uniform(kw, (fan_in, fan_out), jnp.float32, -bound, bound)
        b = jax.random.uniform(kb, (fan_out,), jnp.float32, -bound, bound)
        return w, b

    w1, b1 = linear(ks[0], ks[1], D_in, H)
    w2, b2 = linear(ks[2], ks[3], H, 64)
    w3, b3 = linear(ks[4], ks[5], 64, D_out)
    return {"w1": w1, "b1": b1, "w2": w2, "b2": b2, "w3": w3, "b3": b3}


def net_forward_ref(x, params):
    """Pure-JAX f32 reference (eval-mode dropout = identity)."""
    h1 = jnp.maximum(x @ params["w1"] + params["b1"], 0.0)
    h2 = jnp.tanh(h1 @ params["w2"] + params["b2"])
    return h2 @ params["w3"] + params["b3"]


if __name__ == "__main__":
    key = jax.random.PRNGKey(0)
    k_x, k_p = jax.random.split(key)

    # B=256 with default batch_tile=512 -> bt=128, grid=(2,): two parallel steps so
    # v7x can use both TensorCores; no batch or feature padding anywhere.
    B, D_in, H, D_out = 256, 32, 32, 16
    x = jax.random.normal(k_x, (B, D_in), dtype=jnp.float32)
    params = init_params(k_p, D_in, H, D_out)
    prepped = prepare_params(params)   # hoisted out of the forward: one-time cast/reshape

    out = jax.block_until_ready(net_forward(x, prepped))
    ref = net_forward_ref(x, params)
    assert out.shape == (B, D_out), out.shape
    # bf16 MXU operands -> relaxed tolerance vs the f32 reference.
    assert jnp.allclose(out, ref, atol=2e-2, rtol=2e-2), "mismatch vs JAX reference"

    # Small-batch path: single full-batch block, grid=(1,).
    out_small = jax.block_until_ready(net_forward(x[:8], prepped))
    assert jnp.allclose(out_small, ref[:8], atol=2e-2, rtol=2e-2), "small-batch mismatch"

    print("KERNEL_OK")
</pallas_src>

<mosaic_0001>
module attributes {stable_mosaic.version = 11 : i64} {
  func.func @mlp_kernel(%arg0: i32, %arg1: memref<128x32xf32, #tpu.memory_space<vmem>>, %arg2: memref<32x32xbf16, #tpu.memory_space<vmem>>, %arg3: memref<1x32xf32, #tpu.memory_space<vmem>>, %arg4: memref<32x64xbf16, #tpu.memory_space<vmem>>, %arg5: memref<1x64xf32, #tpu.memory_space<vmem>>, %arg6: memref<64x16xbf16, #tpu.memory_space<vmem>>, %arg7: memref<1x16xf32, #tpu.memory_space<vmem>>, %arg8: memref<128x16xf32, #tpu.memory_space<vmem>>) attributes {dimension_semantics = [#tpu.dimension_semantics<parallel>], iteration_bounds = array<i64: 2>, scalar_prefetch = 0 : i64, scratch_operands = 0 : i64, tpu.core_type = #tpu.core_type<tc>, window_params = [{transform_indices = @transform_0, window_bounds = array<i64: 128, 32>}, {pipeline_mode = #tpu.pipeline_mode<synchronous>, transform_indices = @transform_1, window_bounds = array<i64: 32, 32>}, {pipeline_mode = #tpu.pipeline_mode<synchronous>, transform_indices = @transform_2, window_bounds = array<i64: 1, 32>}, {pipeline_mode = #tpu.pipeline_mode<synchronous>, transform_indices = @transform_3, window_bounds = array<i64: 32, 64>}, {pipeline_mode = #tpu.pipeline_mode<synchronous>, transform_indices = @transform_4, window_bounds = array<i64: 1, 64>}, {pipeline_mode = #tpu.pipeline_mode<synchronous>, transform_indices = @transform_5, window_bounds = array<i64: 64, 16>}, {pipeline_mode = #tpu.pipeline_mode<synchronous>, transform_indices = @transform_6, window_bounds = array<i64: 1, 16>}, {transform_indices = @transform_7, window_bounds = array<i64: 128, 16>}]} {
    %c0 = arith.constant 0 : index
    %c0_0 = arith.constant 0 : index
    %0 = vector.load %arg1[%c0, %c0_0] : memref<128x32xf32, #tpu.memory_space<vmem>>, vector<128x32xf32>
    %1 = arith.truncf %0 : vector<128x32xf32> to vector<128x32xbf16>
    %c0_1 = arith.constant 0 : index
    %c0_2 = arith.constant 0 : index
    %2 = vector.load %arg2[%c0_1, %c0_2] : memref<32x32xbf16, #tpu.memory_space<vmem>>, vector<32x32xbf16>
    %cst = arith.constant dense<0.000000e+00> : vector<128x32xf32>
    %3 = tpu.matmul %1, %2, %cst {dimension_numbers = #tpu.dot_dimension_numbers<[1], [0], [0], [1], [0, 0, 1, 1], [], []>} : vector<128x32xbf16>, vector<32x32xbf16>, vector<128x32xf32> -> vector<128x32xf32>
    %c0_3 = arith.constant 0 : index
    %c0_4 = arith.constant 0 : index
    %4 = vector.load %arg3[%c0_3, %c0_4] : memref<1x32xf32, #tpu.memory_space<vmem>>, vector<1x32xf32>
    %5 = vector.broadcast %4 : vector<1x32xf32> to vector<128x32xf32>
    %6 = arith.addf %3, %5 : vector<128x32xf32>
    %cst_5 = arith.constant 0.000000e+00 : f32
    %7 = vector.broadcast %cst_5 : f32 to vector<128x32xf32>
    %8 = arith.maximumf %6, %7 : vector<128x32xf32>
    %9 = arith.truncf %8 : vector<128x32xf32> to vector<128x32xbf16>
    %c0_6 = arith.constant 0 : index
    %c0_7 = arith.constant 0 : index
    %10 = vector.load %arg4[%c0_6, %c0_7] : memref<32x64xbf16, #tpu.memory_space<vmem>>, vector<32x64xbf16>
    %cst_8 = arith.constant dense<0.000000e+00> : vector<128x64xf32>
    %11 = tpu.matmul %9, %10, %cst_8 {dimension_numbers = #tpu.dot_dimension_numbers<[1], [0], [0], [1], [0, 0, 1, 1], [], []>} : vector<128x32xbf16>, vector<32x64xbf16>, vector<128x64xf32> -> vector<128x64xf32>
    %c0_9 = arith.constant 0 : index
    %c0_10 = arith.constant 0 : index
    %12 = vector.load %arg5[%c0_9, %c0_10] : memref<1x64xf32, #tpu.memory_space<vmem>>, vector<1x64xf32>
    %13 = vector.broadcast %12 : vector<1x64xf32> to vector<128x64xf32>
    %14 = arith.addf %11, %13 : vector<128x64xf32>
    %15 = math.tanh %14 : vector<128x64xf32>
    %16 = arith.truncf %15 : vector<128x64xf32> to vector<128x64xbf16>
    %c0_11 = arith.constant 0 : index
    %c0_12 = arith.constant 0 : index
    %17 = vector.load %arg6[%c0_11, %c0_12] : memref<64x16xbf16, #tpu.memory_space<vmem>>, vector<64x16xbf16>
    %cst_13 = arith.constant dense<0.000000e+00> : vector<128x16xf32>
    %18 = tpu.matmul %16, %17, %cst_13 {dimension_numbers = #tpu.dot_dimension_numbers<[1], [0], [0], [1], [0, 0, 1, 1], [], []>} : vector<128x64xbf16>, vector<64x16xbf16>, vector<128x16xf32> -> vector<128x16xf32>
    %c0_14 = arith.constant 0 : index
    %c0_15 = arith.constant 0 : index
    %19 = vector.load %arg7[%c0_14, %c0_15] : memref<1x16xf32, #tpu.memory_space<vmem>>, vector<1x16xf32>
    %20 = vector.broadcast %19 : vector<1x16xf32> to vector<128x16xf32>
    %21 = arith.addf %18, %20 : vector<128x16xf32>
    %c0_16 = arith.constant 0 : index
    %c0_17 = arith.constant 0 : index
    %22 = vector.load %arg8[%c0_16, %c0_17] : memref<128x16xf32, #tpu.memory_space<vmem>>, vector<128x16xf32>
    tpu.vector_store %arg8[%c0_16, %c0_17], %21 {strides = array<i32>} : memref<128x16xf32, #tpu.memory_space<vmem>>, vector<128x16xf32>,
    return
  }
  func.func @transform_0(%arg0: i32) -> (i32, i32) {
    %c0_i32 = arith.constant 0 : i32
    %c0_i32_0 = arith.constant 0 : i32
    return %arg0, %c0_i32 : i32, i32
  }
  func.func @transform_1(%arg0: i32) -> (i32, i32) {
    %c0_i32 = arith.constant 0 : i32
    %c0_i32_0 = arith.constant 0 : i32
    %c0_i32_1 = arith.constant 0 : i32
    return %c0_i32, %c0_i32_0 : i32, i32
  }
  func.func @transform_2(%arg0: i32) -> (i32, i32) {
    %c0_i32 = arith.constant 0 : i32
    %c0_i32_0 = arith.constant 0 : i32
    %c0_i32_1 = arith.constant 0 : i32
    return %c0_i32, %c0_i32_0 : i32, i32
  }
  func.func @transform_3(%arg0: i32) -> (i32, i32) {
    %c0_i32 = arith.constant 0 : i32
    %c0_i32_0 = arith.constant 0 : i32
    %c0_i32_1 = arith.constant 0 : i32
    return %c0_i32, %c0_i32_0 : i32, i32
  }
  func.func @transform_4(%arg0: i32) -> (i32, i32) {
    %c0_i32 = arith.constant 0 : i32
    %c0_i32_0 = arith.constant 0 : i32
    %c0_i32_1 = arith.constant 0 : i32
    return %c0_i32, %c0_i32_0 : i32, i32
  }
  func.func @transform_5(%arg0: i32) -> (i32, i32) {
    %c0_i32 = arith.constant 0 : i32
    %c0_i32_0 = arith.constant 0 : i32
    %c0_i32_1 = arith.constant 0 : i32
    return %c0_i32, %c0_i32_0 : i32, i32
  }
  func.func @transform_6(%arg0: i32) -> (i32, i32) {
    %c0_i32 = arith.constant 0 : i32
    %c0_i32_0 = arith.constant 0 : i32
    %c0_i32_1 = arith.constant 0 : i32
    return %c0_i32, %c0_i32_0 : i32, i32
  }
  func.func @transform_7(%arg0: i32) -> (i32, i32) {
    %c0_i32 = arith.constant 0 : i32
    %c0_i32_0 = arith.constant 0 : i32
    return %arg0, %c0_i32 : i32, i32
  }
}

</mosaic_0001>

<bundles_post_ra>
// kernel: net_forward.1
= control target key start
LH: loop header
LB: loop body
LE: loop exit
PB: predicated region body
PF: predicated region fallthrough
CT: control target
= control target key end

     0   :  { %s1120_s24 = smov 0   ;;  %s1253_s0 = inlined_call_operand.vmem [shape: f32[256,32], index: 0, kind: input, shape index: {}]   ;;  %s1254_s1 = inlined_call_operand.vmem [shape: bf16[32,32], index: 1, kind: input, shape index: {}]   ;;  %s1255_s2 = inlined_call_operand.vmem [shape: f32[1,32], index: 2, kind: input, shape index: {}]   ;;  %s1256_s3 = inlined_call_operand.vmem [shape: bf16[32,64], index: 3, kind: input, shape index: {}]   ;;  %s1257_s4 = inlined_call_operand.vmem [shape: f32[1,64], index: 4, kind: input, shape index: {}]   ;;  %s1258_s5 = inlined_call_operand.vmem [shape: bf16[64,16], index: 5, kind: input, shape index: {}]   ;;  %s1259_s6 = inlined_call_operand.vmem [shape: f32[1,16], index: 6, kind: input, shape index: {}]   ;;  %s1260_s7 = inlined_call_operand.vmem [shape: f32[256,16], index: 7, kind: output, shape index: {}]  }
   0x1 LB: > { %s878_s25 = sadd.s32 4294967295, %s1078_s24   ;;  %p882_p0 = scmp.ge.s32.totalorder %s1078_s24, 1  ;;  %s1078_s24 = sphi %s1120_s24, %s17_s24  }
   0x2   : > { %p238_p1 = scmp.lt.s32.totalorder %s1078_s24, 3 }
   0x4   : > { %p239_p2 = pnand %p882_p0, %p238_p1 }
   0x5   : > { %v1032_v0 = vld [vmem:[%s1254_s1] sm:$0xff] (!%p239_p2)   ;;  %s883_s28 = sshll.u32 (!%p239_p2), %s878_s25, 4  ;;  %v1033_v1 = vld [vmem:[%s1254_s1 + $0x8] sm:$0xff] (!%p239_p2)   ;;  %vm330_vm0 = vcmask (!%p239_p2), 261120   ;;  %vm683_vm1 = vcmask (!%p239_p2), 523264   ;;  %vm805_vm2 = vcmask (!%p239_p2), 130048  }
   0x6   : > { %242 = sbr.rel (%p239_p2) target bundleno = 715 (0x2cb), region = 48  ;;  %p271_p3 = scmp.lt.s32.totalorder (!%p239_p2), %s883_s28, 31  ;;  %956 = vmatprep.subr.bf16.mxu0 (!%p239_p2), %v1032_v0  ;;  %1020 = vmatprep.subr.bf16.mxu1 (!%p239_p2), %v1032_v0  ;;  %v1034_v2 = vld [vmem:[%s1256_s3] sm:$0xff] (!%p239_p2)   ;;  %v1035_v27 = vld [vmem:[%s1256_s3 + $0x8] sm:$0xff] (!%p239_p2)  }
   0x7   : > { %957 = vmatpush3.bf16.msra.mxu0 (!%p239_p2), %v1032_v0  ;;  %1022 = vmatpush3.bf16.msra.mxu1 (!%p239_p2), %v1032_v0  ;;  %v887_v28 = vld [vmem:[%s1255_s2] ss:$0 sm:$0xff] (!%p239_p2) }
   0x8   : > { %958 = vmatprep.subr.bf16.mxu0 (!%p239_p2), %v1033_v1  ;;  %1021 = vmatprep.subr.bf16.mxu1 (!%p239_p2), %v1033_v1 }
   0xb   : > { %959 = vmatpush3.bf16.msra.mxu0 (!%p239_p2), %v1033_v1  ;;  %1023 = vmatpush3.bf16.msra.mxu1 (!%p239_p2), %v1033_v1 }
   0xc   : > { %976 = vmatprep.subr.bf16.mxu1 (!%p239_p2), %v1034_v2 }
   0xd   : > { %s1262_s28 = smov (!%p271_p3, %s883_s28), 31 }
   0xe   : > { %s884_s10 = sshll.u32 %s1262_s28, 3 }
   0xf   : > { %s1145_s13 = scalar_lea.vmem %s1253_s0, %s884_s10  ;;  %s1216_s12 = scalar_lea.vmem %s1260_s7, %s884_s10 }
  0x10   : > { %v283_v3 = vld [vmem:[%s1145_s13] sm:$0xff]  ;;  %v284_v4 = vld [vmem:[%s1145_s13 + $0x8] sm:$0xff]  ;;  %v285_v5 = vld [vmem:[%s1145_s13 + $0x10] sm:$0xff] }
  0x11   : > { %v299_v6 = vpack.c.bf16 %v284_v4, %v283_v3  ;;  %v286_v7 = vld [vmem:[%s1145_s13 + $0x18] sm:$0xff]  ;;  %v287_v8 = vld [vmem:[%s1145_s13 + $0x20] sm:$0xff]  ;;  %v288_v9 = vld [vmem:[%s1145_s13 + $0x28] sm:$0xff] }
  0x12   : > { %v300_v10 = vpack.c.bf16 %v286_v7, %v285_v5  ;;  %v301_v11 = vpack.c.bf16 %v288_v9, %v287_v8  ;;  %v291_v12 = vld [vmem:[%s1145_s13 + $0x40] sm:$0xff]  ;;  %v292_v13 = vld [vmem:[%s1145_s13 + $0x48] sm:$0xff]  ;;  %v293_v14 = vld [vmem:[%s1145_s13 + $0x50] sm:$0xff] }
  0x13   : > { %960 = vmatprep.mubr.msk.bf16.mxu0 %vm330_vm0, %v299_v6  ;;  %v294_v15 = vld [vmem:[%s1145_s13 + $0x58] sm:$0xff]  ;;  %v303_v16 = vpack.c.bf16 %v292_v13, %v291_v12  ;;  %v295_v18 = vld [vmem:[%s1145_s13 + $0x60] sm:$0xff]  ;;  %v296_v19 = vld [vmem:[%s1145_s13 + $0x68] sm:$0xff] }
  0x14   : > { %961 = vmatmul.mubr.msk.bf16.vlgmr.msra.gmra.mrb[0].mxu0 %vm330_vm0, %v300_v10  ;;  %v304_v17 = vpack.c.bf16 %v294_v15, %v293_v14  ;;  %v289_v20 = vld [vmem:[%s1145_s13 + $0x30] sm:$0xff]  ;;  %v290_v21 = vld [vmem:[%s1145_s13 + $0x38] sm:$0xff]  ;;  %v305_v22 = vpack.c.bf16 %v296_v19, %v295_v18 }
  0x15   : > { %964 = vmatprep.mubr.msk.bf16.mxu0 %vm330_vm0, %v301_v11  ;;  %968 = vmatprep.mubr.msk.bf16.mxu1 %vm330_vm0, %v303_v16  ;;  %v302_v23 = vpack.c.bf16 %v290_v21, %v289_v20  ;;  %v297_v24 = vld [vmem:[%s1145_s13 + $0x70] sm:$0xff]  ;;  %v298_v25 = vld [vmem:[%s1145_s13 + $0x78] sm:$0xff]  ;;  %v1036_v21 = vld [vmem:[%s1258_s5] sm:$0xff]  }
  0x16   : > { %969 = vmatmul.mubr.msk.bf16.vlgmr.msra.gmra.mrb[0].mxu1 %vm330_vm0, %v304_v17  ;;  %v306_v26 = vpack.c.bf16 %v298_v25, %v297_v24  ;;  %996 = vmatprep.subr.bf16.mxu0 %v1036_v21  ;;  %v1039_v24 = vld [vmem:[%s1258_s5 + $0x18] sm:$0xff]   ;;  %v898_v25 = vld [vmem:[%s1257_s4] ss:$0 sm:$0xff] }
  0x17   : > { %972 = vmatprep.mubr.msk.bf16.mxu1 %vm330_vm0, %v305_v22  ;;  %977 = vmatpush3.bf16.msra.mxu1 %v1034_v2  ;;  %v1037_v22 = vld [vmem:[%s1258_s5 + $0x8] sm:$0xff]  }
  0x18   : > { %978 = vmatprep.subr.bf16.mxu1 %v1035_v27  ;;  %997 = vmatpush3.bf16.msra.mxu0 %v1036_v21 }
  0x19   : > { %998 = vmatprep.subr.bf16.mxu0 %v1037_v22 }
  0x1b   : > { %979 = vmatpush3.bf16.msra.mxu1 %v1035_v27 }
  0x1c   : > { %965 = vmatmul.mubr.msk.bf16.gmra.mrb[4].mxu0 %vm330_vm0, %v302_v23  ;;  %v1038_v23 = vld [vmem:[%s1258_s5 + $0x10] sm:$0xff]  }
  0x1d   : > { %999 = vmatpush3.bf16.msra.mxu0 %v1037_v22 }
  0x1e   : > { %973 = vmatmul.mubr.msk.bf16.gmra.mrb[4].mxu1 %vm330_vm0, %v306_v26  ;;  %1000 = vmatprep.subr.bf16.mxu0 %v1038_v23 }
  0x21   : > { %1001 = vmatpush3.bf16.msra.mxu0 %v1038_v23 }
  0x22   : > { %1002 = vmatprep.subr.bf16.mxu0 %v1039_v24 }
  0x25   : > { %1003 = vmatpush3.bf16.msra.mxu0 %v1039_v24 }
  0xe7   : > { %v962_v29 = vpop.f32.mrb[0].mxu0 }
  0xe8   : > { %v398_v30 = vadd.f32 %v962_v29, %v887_v28  ;;  %v389_v31 = vpop.f32.mrb[1].mxu0 }
  0xe9   : > { %v390_v32 = vadd.f32 %v887_v28, %v389_v31  ;;  %v963_v33 = vpop.f32.mrb[2].mxu0  ;;  %v970_v36 = vpop.f32.mrb[0].mxu1 }
  0xea   : > { %v401_v34 = vadd.f32 %v963_v33, %v887_v28  ;;  %v392_v35 = vpop.f32.mrb[3].mxu0  ;;  %v430_v38 = vadd.f32 %v970_v36, %v887_v28  ;;  %v421_v39 = vpop.f32.mrb[1].mxu1  ;;  %v454_v40 = vmax.f32 %v398_v30, 0.0 }
  0xeb   : > { %v393_v37 = vadd.f32 %v887_v28, %v392_v35  ;;  %v422_v42 = vadd.f32 %v887_v28, %v421_v39  ;;  %v971_v43 = vpop.f32.mrb[2].mxu1  ;;  %v452_v44 = vmax.f32 %v390_v32, 0.0 }
  0xec   : > { %v455_v41 = vmax.f32 %v401_v34, 0.0  ;;  %v462_v46 = vmax.f32 %v430_v38, 0.0  ;;  %v433_v47 = vadd.f32 %v971_v43, %v887_v28  ;;  %v424_v48 = vpop.f32.mrb[3].mxu1 }
  0xed   : > { %v453_v45 = vmax.f32 %v393_v37, 0.0  ;;  %v460_v50 = vmax.f32 %v422_v42, 0.0  ;;  %v425_v51 = vadd.f32 %v887_v28, %v424_v48 }
  0xee   : > { %v469_v49 = vpack.c.bf16 %v455_v41, %v454_v40  ;;  %v463_v54 = vmax.f32 %v433_v47, 0.0 }
  0xef   : > { %v468_v52 = vpack.c.bf16 %v453_v45, %v452_v44  ;;  %v966_v53 = vpop.f32.mrb[4].mxu0  ;;  %v461_v57 = vmax.f32 %v425_v51, 0.0 }
  0xf0   : > { %v414_v55 = vadd.f32 %v966_v53, %v887_v28  ;;  %v405_v56 = vpop.f32.mrb[5].mxu0  ;;  %v473_v60 = vpack.c.bf16 %v463_v54, %v462_v46 }
  0xf1   : > { %v406_v58 = vadd.f32 %v887_v28, %v405_v56  ;;  %v967_v59 = vpop.f32.mrb[6].mxu0  ;;  %980 = vmatprep.mubr.msk.bf16.mxu1 %vm330_vm0, %v468_v52  ;;  %v472_v63 = vpack.c.bf16 %v461_v57, %v460_v50  ;;  %v974_v0 = vpop.f32.mrb[4].mxu1 }
  0xf2   : > { %v417_v61 = vadd.f32 %v967_v59, %v887_v28  ;;  %v408_v62 = vpop.f32.mrb[7].mxu0  ;;  %981 = vmatmul.mubr.msk.bf16.vlgmr.msra.gmra.mrb[8].mxu1 %vm330_vm0, %v469_v49  ;;  %v446_v2 = vadd.f32 %v974_v0, %v887_v28  ;;  %v437_v3 = vpop.f32.mrb[5].mxu1  ;;  %v458_v4 = vmax.f32 %v414_v55, 0.0 }
  0xf3   : > { %v409_v1 = vadd.f32 %v887_v28, %v408_v62  ;;  %v438_v6 = vadd.f32 %v887_v28, %v437_v3  ;;  %v975_v7 = vpop.f32.mrb[6].mxu1  ;;  %v456_v8 = vmax.f32 %v406_v58, 0.0 }
  0xf4   : > { %v459_v5 = vmax.f32 %v417_v61, 0.0  ;;  %v466_v10 = vmax.f32 %v446_v2, 0.0  ;;  %v449_v11 = vadd.f32 %v975_v7, %v887_v28  ;;  %v440_v12 = vpop.f32.mrb[7].mxu1 }
  0xf5   : > { %v457_v9 = vmax.f32 %v409_v1, 0.0  ;;  %v464_v14 = vmax.f32 %v438_v6, 0.0  ;;  %v441_v15 = vadd.f32 %v887_v28, %v440_v12 }
  0xf6   : > { %v471_v13 = vpack.c.bf16 %v459_v5, %v458_v4  ;;  %v467_v17 = vmax.f32 %v449_v11, 0.0 }
  0xf7   : > { %v470_v16 = vpack.c.bf16 %v457_v9, %v456_v8  ;;  %v465_v18 = vmax.f32 %v441_v15, 0.0 }
  0xf8   : > { %v475_v19 = vpack.c.bf16 %v467_v17, %v466_v10 }
  0xf9   : > { %984 = vmatprep.mubr.msk.bf16.mxu1 %vm330_vm0, %v470_v16  ;;  %v474_v20 = vpack.c.bf16 %v465_v18, %v464_v14  ;;  %v909_v18 = vld [vmem:[%s1259_s6] ss:$0 sm:$0xff] }
  0xfa   : > { %985 = vmatmul.mubr.msk.bf16.gmra.mrb[12].mxu1 %vm330_vm0, %v471_v13 }
  0xfb   : > { %988 = vmatprep.mubr.msk.bf16.mxu1 %vm330_vm0, %v472_v63 }
 0x102   : > { %989 = vmatmul.mubr.msk.bf16.gmra.mrb[16].mxu1 %vm330_vm0, %v473_v60 }
 0x103   : > { %992 = vmatprep.mubr.msk.bf16.mxu1 %vm330_vm0, %v474_v20 }
 0x10a   : > { %993 = vmatmul.mubr.msk.bf16.gmra.mrb[20].mxu1 %vm330_vm0, %v475_v19 }
 0x1c5   : > { %v982_v26 = vpop.f32.mrb[8].mxu1 }
 0x1c6   : > { %v566_v27 = vadd.f32 %v982_v26, %v898_v25  ;;  %v557_v28 = vpop.f32.mrb[9].mxu1 }
 0x1c7   : > { %v558_v29 = vadd.f32 %v898_v25, %v557_v28  ;;  %v983_v30 = vpop.f32.mrb[10].mxu1 }
 0x1c8   : > { %1040 = vtanh.f32 %v566_v27  ;;  %v569_v31 = vadd.f32 %v983_v30, %v898_v25  ;;  %v560_v32 = vpop.f32.mrb[11].mxu1 }
 0x1c9   : > { %1042 = vtanh.f32 %v558_v29  ;;  %v561_v33 = vadd.f32 %v898_v25, %v560_v32 }
 0x1ca   : > { %1044 = vtanh.f32 %v569_v31 }
 0x1cb   : > { %1046 = vtanh.f32 %v561_v33 }
 0x1cd   : > { %v986_v34 = vpop.f32.mrb[12].mxu1 }
 0x1ce   : > { %v582_v35 = vadd.f32 %v986_v34, %v898_v25  ;;  %v573_v36 = vpop.f32.mrb[13].mxu1 }
 0x1cf   : > { %v574_v37 = vadd.f32 %v898_v25, %v573_v36  ;;  %v987_v38 = vpop.f32.mrb[14].mxu1 }
 0x1d0   : > { %1048 = vtanh.f32 %v582_v35  ;;  %v585_v39 = vadd.f32 %v987_v38, %v898_v25  ;;  %v576_v40 = vpop.f32.mrb[15].mxu1 }
 0x1d1   : > { %1050 = vtanh.f32 %v574_v37  ;;  %v577_v41 = vadd.f32 %v898_v25, %v576_v40 }
 0x1d2   : > { %v1041_v42 = vpop.eup %1040  ;;  %1052 = vtanh.f32 %v585_v39 }
 0x1d3   : > { %v1043_v43 = vpop.eup %1042  ;;  %1054 = vtanh.f32 %v577_v41 }
 0x1d4   : > { %v1045_v44 = vpop.eup %1044 }
 0x1d5   : > { %v1047_v45 = vpop.eup %1046  ;;  %v637_v46 = vpack.c.bf16 %v1045_v44, %v1041_v42  ;;  %v990_v47 = vpop.f32.mrb[16].mxu1 }
 0x1d6   : > { %v598_v48 = vadd.f32 %v990_v47, %v898_v25  ;;  %v589_v49 = vpop.f32.mrb[17].mxu1  ;;  %v636_v50 = vpack.c.bf16 %v1047_v45, %v1043_v43 }
 0x1d7   : > { %v590_v51 = vadd.f32 %v898_v25, %v589_v49  ;;  %v991_v52 = vpop.f32.mrb[18].mxu1 }
 0x1d8   : > { %1056 = vtanh.f32 %v598_v48  ;;  %v601_v53 = vadd.f32 %v991_v52, %v898_v25  ;;  %v592_v54 = vpop.f32.mrb[19].mxu1  ;;  %1004 = vmatprep.mubr.msk.bf16.mxu0 %vm683_vm1, %v636_v50 }
 0x1d9   : > { %1058 = vtanh.f32 %v590_v51  ;;  %v593_v55 = vadd.f32 %v898_v25, %v592_v54  ;;  %1005 = vmatmul.mubr.msk.bf16.vlgmr.msra.gmra.mrb[8].mxu0 %vm683_vm1, %v637_v46 }
 0x1da   : > { %v1049_v56 = vpop.eup %1048  ;;  %1060 = vtanh.f32 %v601_v53 }
 0x1db   : > { %v1051_v57 = vpop.eup %1050  ;;  %1062 = vtanh.f32 %v593_v55 }
 0x1dc   : > { %v1053_v58 = vpop.eup %1052 }
 0x1dd   : > { %v1055_v59 = vpop.eup %1054  ;;  %v994_v60 = vpop.f32.mrb[20].mxu1  ;;  %v639_v61 = vpack.c.bf16 %v1053_v58, %v1049_v56 }
 0x1de   : > { %v614_v62 = vadd.f32 %v994_v60, %v898_v25  ;;  %v605_v63 = vpop.f32.mrb[21].mxu1  ;;  %v638_v0 = vpack.c.bf16 %v1055_v59, %v1051_v57 }
 0x1df   : > { %v606_v1 = vadd.f32 %v898_v25, %v605_v63  ;;  %v995_v2 = vpop.f32.mrb[22].mxu1 }
 0x1e0   : > { %1064 = vtanh.f32 %v614_v62  ;;  %v617_v3 = vadd.f32 %v995_v2, %v898_v25  ;;  %v608_v4 = vpop.f32.mrb[23].mxu1  ;;  %1008 = vmatprep.mubr.msk.bf16.mxu0 %vm683_vm1, %v638_v0 }
 0x1e1   : > { %1066 = vtanh.f32 %v606_v1  ;;  %v609_v5 = vadd.f32 %v898_v25, %v608_v4  ;;  %1009 = vmatmul.mubr.msk.bf16.gmra.mrb[12].mxu0 %vm683_vm1, %v639_v61 }
 0x1e2   : > { %v1057_v6 = vpop.eup %1056  ;;  %1068 = vtanh.f32 %v617_v3 }
 0x1e3   : > { %v1059_v7 = vpop.eup %1058  ;;  %1070 = vtanh.f32 %v609_v5 }
 0x1e4   : > { %v1061_v8 = vpop.eup %1060 }
 0x1e5   : > { %v1063_v9 = vpop.eup %1062  ;;  %v641_v10 = vpack.c.bf16 %v1061_v8, %v1057_v6 }
 0x1e6   : > { %v640_v11 = vpack.c.bf16 %v1063_v9, %v1059_v7 }
 0x1e8   : > { %1012 = vmatprep.mubr.msk.bf16.mxu0 %vm683_vm1, %v640_v11 }
 0x1e9   : > { %1013 = vmatmul.mubr.msk.bf16.gmra.mrb[16].mxu0 %vm683_vm1, %v641_v10 }
 0x1ea   : > { %v1065_v12 = vpop.eup %1064 }
 0x1eb   : > { %v1067_v13 = vpop.eup %1066 }
 0x1ec   : > { %v1069_v14 = vpop.eup %1068 }
 0x1ed   : > { %v1071_v15 = vpop.eup %1070  ;;  %v643_v16 = vpack.c.bf16 %v1069_v14, %v1065_v12 }
 0x1ee   : > { %v642_v17 = vpack.c.bf16 %v1071_v15, %v1067_v13 }
 0x1f0   : > { %1016 = vmatprep.mubr.msk.bf16.mxu0 %vm683_vm1, %v642_v17 }
 0x1f1   : > { %1017 = vmatmul.mubr.msk.bf16.gmra.mrb[20].mxu0 %vm683_vm1, %v643_v16 }
 0x2ac   : > { %v1006_v19 = vpop.f32.mrb[8].mxu0 }
 0x2ad   : > { %v751_v20 = vadd.f32 %v1006_v19, %v909_v18  ;;  %v742_v21 = vpop.f32.mrb[9].mxu0 }
 0x2ae   : > { %v743_v22 = vadd.f32 %v909_v18, %v742_v21  ;;  %v1007_v23 = vpop.f32.mrb[10].mxu0 }
 0x2af   : > { %808 = vst.msk [vmem:[%s1216_s12 + $0x10] sm:$0xff] %vm805_vm2, %v751_v20  ;;  %v754_v24 = vadd.f32 %v1007_v23, %v909_v18  ;;  %v745_v25 = vpop.f32.mrb[11].mxu0 }
 0x2b0   : > { %806 = vst.msk [vmem:[%s1216_s12] sm:$0xff] %vm805_vm2, %v743_v22  ;;  %v746_v26 = vadd.f32 %v909_v18, %v745_v25 }
 0x2b1   : > { %809 = vst.msk [vmem:[%s1216_s12 + $0x18] sm:$0xff] %vm805_vm2, %v754_v24 }
 0x2b2   : > { %807 = vst.msk [vmem:[%s1216_s12 + $0x8] sm:$0xff] %vm805_vm2, %v746_v26 }
 0x2b4   : > { %v1010_v27 = vpop.f32.mrb[12].mxu0 }
 0x2b5   : > { %v767_v28 = vadd.f32 %v1010_v27, %v909_v18  ;;  %v758_v29 = vpop.f32.mrb[13].mxu0 }
 0x2b6   : > { %v759_v30 = vadd.f32 %v909_v18, %v758_v29  ;;  %v1011_v31 = vpop.f32.mrb[14].mxu0 }
 0x2b7   : > { %812 = vst.msk [vmem:[%s1216_s12 + $0x30] sm:$0xff] %vm805_vm2, %v767_v28  ;;  %v770_v32 = vadd.f32 %v1011_v31, %v909_v18  ;;  %v761_v33 = vpop.f32.mrb[15].mxu0 }
 0x2b8   : > { %810 = vst.msk [vmem:[%s1216_s12 + $0x20] sm:$0xff] %vm805_vm2, %v759_v30  ;;  %v762_v34 = vadd.f32 %v909_v18, %v761_v33 }
 0x2b9   : > { %813 = vst.msk [vmem:[%s1216_s12 + $0x38] sm:$0xff] %vm805_vm2, %v770_v32 }
 0x2ba   : > { %811 = vst.msk [vmem:[%s1216_s12 + $0x28] sm:$0xff] %vm805_vm2, %v762_v34 }
 0x2bc   : > { %v1014_v35 = vpop.f32.mrb[16].mxu0 }
 0x2bd   : > { %v783_v36 = vadd.f32 %v1014_v35, %v909_v18  ;;  %v774_v37 = vpop.f32.mrb[17].mxu0 }
 0x2be   : > { %v775_v38 = vadd.f32 %v909_v18, %v774_v37  ;;  %v1015_v39 = vpop.f32.mrb[18].mxu0 }
 0x2bf   : > { %816 = vst.msk [vmem:[%s1216_s12 + $0x50] sm:$0xff] %vm805_vm2, %v783_v36  ;;  %v786_v40 = vadd.f32 %v1015_v39, %v909_v18  ;;  %v777_v41 = vpop.f32.mrb[19].mxu0 }
 0x2c0   : > { %814 = vst.msk [vmem:[%s1216_s12 + $0x40] sm:$0xff] %vm805_vm2, %v775_v38  ;;  %v778_v42 = vadd.f32 %v909_v18, %v777_v41 }
 0x2c1   : > { %817 = vst.msk [vmem:[%s1216_s12 + $0x58] sm:$0xff] %vm805_vm2, %v786_v40 }
 0x2c2   : > { %815 = vst.msk [vmem:[%s1216_s12 + $0x48] sm:$0xff] %vm805_vm2, %v778_v42 }
 0x2c4   : > { %v1018_v43 = vpop.f32.mrb[20].mxu0 }
 0x2c5   : > { %v799_v44 = vadd.f32 %v1018_v43, %v909_v18  ;;  %v790_v45 = vpop.f32.mrb[21].mxu0 }
 0x2c6   : > { %v791_v46 = vadd.f32 %v909_v18, %v790_v45  ;;  %v1019_v47 = vpop.f32.mrb[22].mxu0 }
 0x2c7   : > { %820 = vst.msk [vmem:[%s1216_s12 + $0x70] sm:$0xff] %vm805_vm2, %v799_v44  ;;  %v802_v48 = vadd.f32 %v1019_v47, %v909_v18  ;;  %v793_v49 = vpop.f32.mrb[23].mxu0 }
 0x2c8   : > { %818 = vst.msk [vmem:[%s1216_s12 + $0x60] sm:$0xff] %vm805_vm2, %v791_v46  ;;  %v794_v50 = vadd.f32 %v909_v18, %v793_v49 }
 0x2c9   : > { %821 = vst.msk [vmem:[%s1216_s12 + $0x78] sm:$0xff] %vm805_vm2, %v802_v48 }
 0x2ca   : > { %819 = vst.msk [vmem:[%s1216_s12 + $0x68] sm:$0xff] %vm805_vm2, %v794_v50 }
 0x2cb PF: > { %s17_s24 = sadd.s32 1, %s1078_s24  }
 0x2cc   : > { %p14_p4 = scmp.ge.s32.totalorder %s17_s24, 4  }
 0x2ce   :  { %16 = sbr.rel (!%p14_p4) target bundleno = 1 (0x1), region = 78 }

</bundles_post_ra>
